<compile_context>
chip_gen: v6e
topology: v6e:2x2x1
jax: 0.10.0
libtpu: 0.0.40
codegen_flags: <defaults>
</compile_context>

<pallas_src>
import functools

import jax
import jax.numpy as jnp
from jax.experimental import pallas as pl
from jax.experimental.pallas import tpu as pltpu


def _round_up(n, m):
    return ((n + m - 1) // m) * m


def _fpe_loss_kernel(x_ref, tb_ref, at_ref, a_ref, p_ref, loss_ref, *,
                     metric, inv_d):
    # x tile in compute dtype (MXU operand) + an f32 copy for elementwise work.
    x_mm = x_ref[...]                              # [TB, Dp]
    x = x_mm.astype(jnp.float32)                   # [TB, Dp] f32

    tb = tb_ref[...]                               # [TB, 2]  (t, 0.5*beta)
    t = tb[:, 0:1]                                 # [TB, 1]
    half_beta = tb[:, 1:2]                         # [TB, 1]

    pv = p_ref[...]                                # [8, Dp] packed params
    w = pv[0:1, :]                                 # [1, Dp]
    b = pv[1:2, :]                                 # [1, Dp]
    diag_a = pv[2:3, :]                            # [1, Dp]

    # score model forward: z = x @ A^T + t * w + b ; s = tanh(z)
    z = jnp.dot(x_mm, at_ref[...],
                preferred_element_type=jnp.float32) + t * w + b
    s = jnp.tanh(z)
    sp = 1.0 - s * s                               # tanh'(z)

    # batch_gradient(s, t):  ds[b,i]/dt[b] = tanh'(z_i) * w_i
    ds_dt = sp * w                                 # [TB, Dp]

    # grad_x of  div_x(s) + ||s||^2 + x . s   (exact second-order terms):
    #   d/dx_k div_x(s) = sum_i (-2 s_i sp_i) A_ii A_ik
    #   d/dx_k ||s||^2  = sum_i   2 s_i sp_i       A_ik
    #   d/dx_k (x . s)  = s_k + sum_i x_i sp_i     A_ik
    u = sp * (2.0 * s * (1.0 - diag_a) + x)        # [TB, Dp]
    grad_x = jnp.dot(u.astype(a_ref.dtype), a_ref[...],
                     preferred_element_type=jnp.float32) + s

    r = ds_dt - half_beta * grad_x
    red = jnp.abs(r) if metric == "L1" else r * r
    # Padded feature lanes contribute exactly 0, so sum * (1/D_real) == mean.
    loss_col = jnp.sum(red, axis=1, keepdims=True) * inv_d        # [TB, 1]
    # Lane-dense store: broadcast across 128 lanes -> full unmasked vst.
    loss_ref[...] = jnp.broadcast_to(loss_col, loss_ref.shape)


def score_fpe_loss(x_t, t, beta, A, w, b, metric="L1", *,
                   block_b=512, compute_dtype=jnp.float32):
    """ScoreFPE loss for the fixed score model s = tanh(x @ A^T + t*w + b).

    x_t: [B, D], t/beta: [B, 1], A: [D, D], w/b: [1, D].  Returns [B, 1] f32.
    """
    assert metric in ("L1", "L2")
    f32 = jnp.float32
    B, D = x_t.shape

    # --- padding / tiling decisions -------------------------------------
    Dp = _round_up(max(D, 128), 128)               # full lane occupancy
    TB = _round_up(min(block_b, _round_up(B, 8)), 8)
    B_pad = _round_up(B, TB)
    n_tiles = B_pad // TB

    # --- hoisted preprocessing (once per call, not per grid step) -------
    x_p = jnp.zeros((B_pad, Dp), f32).at[:B, :D].set(x_t.astype(f32))
    tb_p = jnp.zeros((B_pad, 2), f32)
    tb_p = tb_p.at[:B, 0].set(t.reshape(-1).astype(f32))
    tb_p = tb_p.at[:B, 1].set(0.5 * beta.reshape(-1).astype(f32))

    A_p = jnp.zeros((Dp, Dp), f32).at[:D, :D].set(A.astype(f32))
    At_p = A_p.T                                   # A^T precomputed here

    # Packed [w; b; diag(A)] slab, padded to 8 sublanes -> one resident DMA.
    params_p = jnp.zeros((8, Dp), f32)
    params_p = params_p.at[0, :D].set(w.reshape(-1).astype(f32))
    params_p = params_p.at[1, :D].set(b.reshape(-1).astype(f32))
    params_p = params_p.at[2, :D].set(jnp.diagonal(A).astype(f32))

    if compute_dtype != f32:                       # optional bf16 MXU operands
        x_p = x_p.astype(compute_dtype)
        A_p = A_p.astype(compute_dtype)
        At_p = At_p.astype(compute_dtype)

    kernel = functools.partial(_fpe_loss_kernel, metric=metric,
                               inv_d=1.0 / float(D))

    out = pl.pallas_call(
        kernel,
        out_shape=jax.ShapeDtypeStruct((B_pad, 128), f32),
        grid=(n_tiles,),
        in_specs=[
            pl.BlockSpec((TB, Dp), lambda i: (i, 0)),   # x tile (pipelined)
            pl.BlockSpec((TB, 2), lambda i: (i, 0)),    # [t, 0.5*beta] tile
            pl.BlockSpec((Dp, Dp), lambda i: (0, 0)),   # A^T (resident)
            pl.BlockSpec((Dp, Dp), lambda i: (0, 0)),   # A   (resident)
            pl.BlockSpec((8, Dp), lambda i: (0, 0)),    # [w; b; diag(A)]
        ],
        out_specs=pl.BlockSpec((TB, 128), lambda i: (i, 0)),
        compiler_params=pltpu.CompilerParams(
            dimension_semantics=("parallel",),
            vmem_limit_bytes=48 * 1024 * 1024,
        ),
    )(x_p, tb_p, At_p, A_p, params_p)

    return out[:B, :1]                              # [B, 1]


def _reference_loss(x_t, t, beta, A, w, b, metric="L1"):
    """Pure-JAX reference using autodiff (mirrors the torch.autograd code)."""
    wv, bv = w[0], b[0]

    def score_single(xi, ti):                       # xi: [D], ti: scalar
        return jnp.tanh(A @ xi + ti * wv + bv)

    def per_sample(xi, ti, bi):
        def aug(xv):                                # div_x(s) + ||s||^2 + x.s
            sv = score_single(xv, ti)
            J = jax.jacrev(score_single, argnums=0)(xv, ti)
            return jnp.trace(J) + jnp.sum(sv ** 2) + xv @ sv
        grad_x = jax.grad(aug)(xi)
        ds_dt = jax.jacrev(score_single, argnums=1)(xi, ti)      # [D]
        r = ds_dt - 0.5 * bi * grad_x
        if metric == "L1":
            return jnp.mean(jnp.abs(r))
        return jnp.mean(r ** 2)

    return jax.vmap(per_sample)(x_t, t[:, 0], beta[:, 0])[:, None]


def _make_inputs(key, B, D):
    kx, kt, kb, kA, kw, kbias = jax.random.split(key, 6)
    x_t = jax.random.normal(kx, (B, D), jnp.float32)
    t = jax.random.uniform(kt, (B, 1), jnp.float32)
    beta = jax.random.uniform(kb, (B, 1), jnp.float32, minval=0.1, maxval=1.0)
    A = 0.3 * jax.random.normal(kA, (D, D), jnp.float32)
    w = 0.3 * jax.random.normal(kw, (1, D), jnp.float32)
    b = 0.1 * jax.random.normal(kbias, (1, D), jnp.float32)
    return x_t, t, beta, A, w, b


if __name__ == "__main__":
    key = jax.random.PRNGKey(0)
    k1, k2 = jax.random.split(key)

    ok = True

    # Case 1: small single-tile problem (B=8, D=16), both metrics, f32.
    x_t, t, beta, A, w, b = _make_inputs(k1, 8, 16)
    for metric in ("L1", "L2"):
        loss = jax.block_until_ready(
            score_fpe_loss(x_t, t, beta, A, w, b, metric=metric))
        ref = _reference_loss(x_t, t, beta, A, w, b, metric=metric)
        assert loss.shape == (8, 1)
        ok &= bool(jnp.allclose(loss, ref, atol=1e-5, rtol=1e-5))

    # Case 2: multi-tile grid with batch padding (B=10, TB=8 -> 2 grid steps).
    x_t2, t2, beta2, A2, w2, b2 = _make_inputs(k2, 10, 16)
    loss2 = jax.block_until_ready(
        score_fpe_loss(x_t2, t2, beta2, A2, w2, b2, metric="L1", block_b=8))
    ref2 = _reference_loss(x_t2, t2, beta2, A2, w2, b2, metric="L1")
    assert loss2.shape == (10, 1)
    ok &= bool(jnp.allclose(loss2, ref2, atol=1e-5, rtol=1e-5))

    if ok:
        print("KERNEL_OK")
</pallas_src>

<mosaic_0001>
module attributes {stable_mosaic.version = 11 : i64} {
  func.func @_fpe_loss_kernel(%arg0: i32, %arg1: memref<8x128xf32, #tpu.memory_space<vmem>>, %arg2: memref<8x2xf32, #tpu.memory_space<vmem>>, %arg3: memref<128x128xf32, #tpu.memory_space<vmem>>, %arg4: memref<128x128xf32, #tpu.memory_space<vmem>>, %arg5: memref<8x128xf32, #tpu.memory_space<vmem>>, %arg6: memref<8x128xf32, #tpu.memory_space<vmem>>) attributes {dimension_semantics = [#tpu.dimension_semantics<parallel>], iteration_bounds = array<i64: 1>, scalar_prefetch = 0 : i64, scratch_operands = 0 : i64, tpu.core_type = #tpu.core_type<tc>, window_params = [{transform_indices = @transform_0, window_bounds = array<i64: 8, 128>}, {transform_indices = @transform_1, window_bounds = array<i64: 8, 2>}, {pipeline_mode = #tpu.pipeline_mode<synchronous>, transform_indices = @transform_2, window_bounds = array<i64: 128, 128>}, {pipeline_mode = #tpu.pipeline_mode<synchronous>, transform_indices = @transform_3, window_bounds = array<i64: 128, 128>}, {pipeline_mode = #tpu.pipeline_mode<synchronous>, transform_indices = @transform_4, window_bounds = array<i64: 8, 128>}, {transform_indices = @transform_5, window_bounds = array<i64: 8, 128>}]} {
    %c0 = arith.constant 0 : index
    %c0_0 = arith.constant 0 : index
    %0 = vector.load %arg1[%c0, %c0_0] : memref<8x128xf32, #tpu.memory_space<vmem>>, vector<8x128xf32>
    %c0_1 = arith.constant 0 : index
    %c0_2 = arith.constant 0 : index
    %1 = vector.load %arg2[%c0_1, %c0_2] : memref<8x2xf32, #tpu.memory_space<vmem>>, vector<8x2xf32>
    %2 = vector.extract_strided_slice %1 {offsets = [0, 0], sizes = [8, 1], strides = [1, 1]} : vector<8x2xf32> to vector<8x1xf32>
    %3 = vector.extract_strided_slice %1 {offsets = [0, 1], sizes = [8, 1], strides = [1, 1]} : vector<8x2xf32> to vector<8x1xf32>
    %c0_3 = arith.constant 0 : index
    %c0_4 = arith.constant 0 : index
    %4 = vector.load %arg5[%c0_3, %c0_4] : memref<8x128xf32, #tpu.memory_space<vmem>>, vector<8x128xf32>
    %5 = vector.extract_strided_slice %4 {offsets = [0, 0], sizes = [1, 128], strides = [1, 1]} : vector<8x128xf32> to vector<1x128xf32>
    %6 = vector.extract_strided_slice %4 {offsets = [1, 0], sizes = [1, 128], strides = [1, 1]} : vector<8x128xf32> to vector<1x128xf32>
    %7 = vector.extract_strided_slice %4 {offsets = [2, 0], sizes = [1, 128], strides = [1, 1]} : vector<8x128xf32> to vector<1x128xf32>
    %c0_5 = arith.constant 0 : index
    %c0_6 = arith.constant 0 : index
    %8 = vector.load %arg3[%c0_5, %c0_6] : memref<128x128xf32, #tpu.memory_space<vmem>>, vector<128x128xf32>
    %cst = arith.constant dense<0.000000e+00> : vector<8x128xf32>
    %9 = tpu.matmul %0, %8, %cst {dimension_numbers = #tpu.dot_dimension_numbers<[1], [0], [0], [1], [0, 0, 1, 1], [], []>} : vector<8x128xf32>, vector<128x128xf32>, vector<8x128xf32> -> vector<8x128xf32>
    %10 = vector.broadcast %2 : vector<8x1xf32> to vector<8x128xf32>
    %11 = vector.broadcast %5 : vector<1x128xf32> to vector<8x128xf32>
    %12 = arith.mulf %10, %11 : vector<8x128xf32>
    %13 = arith.addf %9, %12 : vector<8x128xf32>
    %14 = vector.broadcast %6 : vector<1x128xf32> to vector<8x128xf32>
    %15 = arith.addf %13, %14 : vector<8x128xf32>
    %16 = math.tanh %15 : vector<8x128xf32>
    %17 = arith.mulf %16, %16 : vector<8x128xf32>
    %cst_7 = arith.constant 1.000000e+00 : f32
    %18 = vector.broadcast %cst_7 : f32 to vector<8x128xf32>
    %19 = arith.subf %18, %17 : vector<8x128xf32>
    %20 = vector.broadcast %5 : vector<1x128xf32> to vector<8x128xf32>
    %21 = arith.mulf %19, %20 : vector<8x128xf32>
    %cst_8 = arith.constant 2.000000e+00 : f32
    %22 = vector.broadcast %cst_8 : f32 to vector<8x128xf32>
    %23 = arith.mulf %22, %16 : vector<8x128xf32>
    %cst_9 = arith.constant 1.000000e+00 : f32
    %24 = vector.broadcast %cst_9 : f32 to vector<1x128xf32>
    %25 = arith.subf %24, %7 : vector<1x128xf32>
    %26 = vector.broadcast %25 : vector<1x128xf32> to vector<8x128xf32>
    %27 = arith.mulf %23, %26 : vector<8x128xf32>
    %28 = arith.addf %27, %0 : vector<8x128xf32>
    %29 = arith.mulf %19, %28 : vector<8x128xf32>
    %c0_10 = arith.constant 0 : index
    %c0_11 = arith.constant 0 : index
    %30 = vector.load %arg4[%c0_10, %c0_11] : memref<128x128xf32, #tpu.memory_space<vmem>>, vector<128x128xf32>
    %cst_12 = arith.constant dense<0.000000e+00> : vector<8x128xf32>
    %31 = tpu.matmul %29, %30, %cst_12 {dimension_numbers = #tpu.dot_dimension_numbers<[1], [0], [0], [1], [0, 0, 1, 1], [], []>} : vector<8x128xf32>, vector<128x128xf32>, vector<8x128xf32> -> vector<8x128xf32>
    %32 = arith.addf %31, %16 : vector<8x128xf32>
    %33 = vector.broadcast %3 : vector<8x1xf32> to vector<8x128xf32>
    %34 = arith.mulf %33, %32 : vector<8x128xf32>
    %35 = arith.subf %21, %34 : vector<8x128xf32>
    %36 = math.absf %35 : vector<8x128xf32>
    %cst_13 = arith.constant dense<0.000000e+00> : vector<8xf32>
    %37 = vector.multi_reduction <add>, %36, %cst_13 [1] : vector<8x128xf32> to vector<8xf32>
    %38 = vector.shape_cast %37 : vector<8xf32> to vector<8x1xf32>
    %cst_14 = arith.constant 6.250000e-02 : f32
    %39 = vector.broadcast %cst_14 : f32 to vector<8x1xf32>
    %40 = arith.mulf %38, %39 : vector<8x1xf32>
    %41 = vector.shape_cast %40 : vector<8x1xf32> to vector<8x1xf32>
    %42 = vector.broadcast %41 : vector<8x1xf32> to vector<8x128xf32>
    %c0_15 = arith.constant 0 : index
    %c0_16 = arith.constant 0 : index
    %43 = vector.load %arg6[%c0_15, %c0_16] : memref<8x128xf32, #tpu.memory_space<vmem>>, vector<8x128xf32>
    tpu.vector_store %arg6[%c0_15, %c0_16], %42 {strides = array<i32>} : memref<8x128xf32, #tpu.memory_space<vmem>>, vector<8x128xf32>,
    return
  }
  func.func @transform_0(%arg0: i32) -> (i32, i32) {
    %c0_i32 = arith.constant 0 : i32
    %c0_i32_0 = arith.constant 0 : i32
    return %arg0, %c0_i32 : i32, i32
  }
  func.func @transform_1(%arg0: i32) -> (i32, i32) {
    %c0_i32 = arith.constant 0 : i32
    %c0_i32_0 = arith.constant 0 : i32
    return %arg0, %c0_i32 : i32, i32
  }
  func.func @transform_2(%arg0: i32) -> (i32, i32) {
    %c0_i32 = arith.constant 0 : i32
    %c0_i32_0 = arith.constant 0 : i32
    %c0_i32_1 = arith.constant 0 : i32
    return %c0_i32, %c0_i32_0 : i32, i32
  }
  func.func @transform_3(%arg0: i32) -> (i32, i32) {
    %c0_i32 = arith.constant 0 : i32
    %c0_i32_0 = arith.constant 0 : i32
    %c0_i32_1 = arith.constant 0 : i32
    return %c0_i32, %c0_i32_0 : i32, i32
  }
  func.func @transform_4(%arg0: i32) -> (i32, i32) {
    %c0_i32 = arith.constant 0 : i32
    %c0_i32_0 = arith.constant 0 : i32
    %c0_i32_1 = arith.constant 0 : i32
    return %c0_i32, %c0_i32_0 : i32, i32
  }
  func.func @transform_5(%arg0: i32) -> (i32, i32) {
    %c0_i32 = arith.constant 0 : i32
    %c0_i32_0 = arith.constant 0 : i32
    return %arg0, %c0_i32 : i32, i32
  }
}

</mosaic_0001>

<bundles_post_ra>
// kernel: tpu_custom_call.1
= control target key start
LH: loop header
LB: loop body
LE: loop exit
PB: predicated region body
PF: predicated region fallthrough
CT: control target
= control target key end

     0   :  { %10 = vsyncpa [#allocation3], 0  ;;  %s561_s0 = inlined_call_operand.vmem [shape: f32[8,128], index: 0, kind: input, shape index: {}]   ;;  %s562_s1 = inlined_call_operand.vmem [shape: f32[8,2], index: 1, kind: input, shape index: {}]   ;;  %s563_s2 = inlined_call_operand.hbm [shape: f32[128,128], index: 2, kind: input, shape index: {}]   ;;  %s564_s3 = inlined_call_operand.hbm [shape: f32[128,128], index: 3, kind: input, shape index: {}]   ;;  %s565_s4 = inlined_call_operand.vmem [shape: f32[8,128], index: 4, kind: input, shape index: {}]   ;;  %s566_s5 = inlined_call_operand.hbm [shape: f32[8,128], index: 5, kind: output, shape index: {}]  }
   0x1   :  { %11 = vsyncpa [#allocation6], 0 }
   0x2   :  { %12 = vsyncpa [#allocation4], 0  ;;  %s462_s18 = smov [#allocation2]  }
   0x3   :  { %s22_s19 = sshll.u32 %s462_s18, 4  ;;  %s23_s19 = int_to_ptr.vmem [resolvable:$true] %s22_s19 }
   0x4   :  { %s404_s20 = scalar_lea.vmem %s23_s19, 2048  ;;  %p409_p1 = scmp.lt.s32.totalorder %s23_s19, %s23_s19 }
   0x5   :  { %p405_p0 = scmp.ne.s32.totalorder %s23_s19, %s404_s20  ;;  %p410_p2 = scmp.lt.s32.totalorder %s404_s20, %s404_s20 }
   0x7   :  { %p411_p3 = por %p410_p2, %p409_p1 }
   0x9   :  { %p412_p4 = pnand %p411_p3, %p405_p0 }
   0xb   :  { %415 = shalt.err (!%p412_p4)
}
   0xc   :  { %s463_s21 = smov 128   ;;  %s464_s22 = smov 8  }
   0xd   :  { %28 = dma.hbm_to_vmem [thread:$0]  %s563_s2, 2048, %s23_s19, [#allocation3], %s463_s21, %s463_s21, %s464_s22  }
   0xe   :  { %s465_s25 = smov [#allocation5]  }
   0xf   :  { %s34_s26 = sshll.u32 %s465_s25, 4  ;;  %s35_s26 = int_to_ptr.vmem [resolvable:$true] %s34_s26 }
  0x10   :  { %s424_s27 = scalar_lea.vmem %s35_s26, 2048  ;;  %p429_p6 = scmp.lt.s32.totalorder %s35_s26, %s35_s26 }
  0x11   :  { %p425_p5 = scmp.ne.s32.totalorder %s35_s26, %s424_s27  ;;  %p430_p7 = scmp.lt.s32.totalorder %s424_s27, %s424_s27 }
  0x13   :  { %p431_p8 = por %p430_p7, %p429_p6 }
  0x15   :  { %p432_p9 = pnand %p431_p8, %p425_p5 }
  0x17   :  { %435 = shalt.err (!%p432_p9)
}
  0x18   :  { %40 = dma.hbm_to_vmem [thread:$0]  %s564_s3, 2048, %s35_s26, [#allocation6], %s463_s21, %s463_s21, %s464_s22  }
  0x19   :  { %456 = dma.done.wait [#allocation3], 2048  }
  0x1a   :  { %457 = vsyncadd [#allocation3], 4294965248 }
  0x1b   :  { %458 = dma.done.wait [#allocation6], 2048  }
  0x1c   :  { %459 = vsyncadd [#allocation6], 4294965248  ;;  %v466_v0 = vmov 0.0   ;;  %vm467_vm0 = vmmov 0   ;;  %v468_v1 = vmov 0   ;;  %v67_v2 = vld [vmem:[#allocation2 + $0x78] sm:$0xff]  ;;  %v73_v37 = vlaneseq }
  0x1d   :  { %313 = vmatprep.subr.mxu0 %v466_v0  ;;  %345 = vmatprep.mubr.msk.f32.mxu0 %vm467_vm0, %v466_v0  ;;  %v66_v3 = vld [vmem:[#allocation2 + $0x70] sm:$0xff]  ;;  %v65_v4 = vld [vmem:[#allocation2 + $0x68] sm:$0xff]  ;;  %v64_v5 = vld [vmem:[#allocation2 + $0x60] sm:$0xff]  ;;  %v469_v36 = vmov 1  }
  0x1e   :  { %392 = vset.pattern.permute.xlu0 %v468_v1  ;;  %348 = vmatprep.subr.mxu1 %v466_v0  ;;  %v516_v6 = vld [vmem:[%s562_s1] sm:$0xff]  ;;  %v63_v7 = vld [vmem:[#allocation2 + $0x58] sm:$0xff]  ;;  %v180_v9 = vld [vmem:[#allocation5 + $0x70] sm:$0xff]  ;;  %v74_v38 = vshrl.u32 %v73_v37, 7 }
  0x1f   :  { %380 = vmatprep.mubr.msk.f32.mxu1 %vm467_vm0, %v466_v0  ;;  %314 = vmatpush3.msra.mxu0 %v67_v2  ;;  %v181_v8 = vld [vmem:[#allocation5 + $0x78] sm:$0xff]  ;;  %v62_v10 = vld [vmem:[#allocation2 + $0x50] sm:$0xff]  ;;  %v61_v11 = vld [vmem:[#allocation2 + $0x48] sm:$0xff] }
  0x20   :  { %315 = vmatprep.subr.mxu0 %v466_v0  ;;  %70 = vperm.xlu0 %392, %v516_v6   ;;  %v60_v12 = vld [vmem:[#allocation2 + $0x40] sm:$0xff]  ;;  %v59_v13 = vld [vmem:[#allocation2 + $0x38] sm:$0xff]  ;;  %v58_v14 = vld [vmem:[#allocation2 + $0x30] sm:$0xff]  ;;  %v75_v39 = vsub.s32 0, %v74_v38  ;;  %v150_v43 = vsub.s32 1, %v74_v38  ;;  %v161_v51 = vsub.s32 2, %v74_v38 }
  0x21   :  { %316 = vmatpush3.msra.mxu0 %v66_v3  ;;  %349 = vmatpush3.msra.mxu1 %v181_v8  ;;  %v57_v15 = vld [vmem:[#allocation2 + $0x28] sm:$0xff]  ;;  %v56_v16 = vld [vmem:[#allocation2 + $0x20] sm:$0xff]  ;;  %v55_v17 = vld [vmem:[#allocation2 + $0x18] sm:$0xff] }
  0x22   :  { %317 = vmatprep.subr.mxu0 %v466_v0  ;;  %350 = vmatprep.subr.mxu1 %v466_v0  ;;  %v54_v18 = vld [vmem:[#allocation2 + $0x10] sm:$0xff]  ;;  %v53_v19 = vld [vmem:[#allocation2 + $0x8] sm:$0xff]  ;;  %v52_v20 = vld [vmem:[#allocation2] sm:$0xff] }
  0x23   :  { %318 = vmatpush3.msra.mxu0 %v65_v4  ;;  %351 = vmatpush3.msra.mxu1 %v180_v9  ;;  %v536_v21 = vld [vmem:[%s561_s0] sm:$0xff]  ;;  %v179_v22 = vld [vmem:[#allocation5 + $0x68] sm:$0xff]  ;;  %v177_v24 = vld [vmem:[#allocation5 + $0x58] sm:$0xff] }
  0x24   :  { %319 = vmatprep.subr.mxu0 %v466_v0  ;;  %352 = vmatprep.subr.mxu1 %v466_v0  ;;  %v178_v23 = vld [vmem:[#allocation5 + $0x60] sm:$0xff]  ;;  %v176_v25 = vld [vmem:[#allocation5 + $0x50] sm:$0xff]  ;;  %v175_v26 = vld [vmem:[#allocation5 + $0x48] sm:$0xff] }
  0x25   :  { %320 = vmatpush3.msra.mxu0 %v64_v5  ;;  %353 = vmatpush3.msra.mxu1 %v179_v22  ;;  %v174_v27 = vld [vmem:[#allocation5 + $0x40] sm:$0xff]  ;;  %v173_v28 = vld [vmem:[#allocation5 + $0x38] sm:$0xff]  ;;  %v172_v29 = vld [vmem:[#allocation5 + $0x30] sm:$0xff] }
  0x26   :  { %321 = vmatprep.subr.mxu0 %v466_v0  ;;  %354 = vmatprep.subr.mxu1 %v466_v0  ;;  %v171_v30 = vld [vmem:[#allocation5 + $0x28] sm:$0xff]  ;;  %v170_v31 = vld [vmem:[#allocation5 + $0x20] sm:$0xff]  ;;  %v169_v32 = vld [vmem:[#allocation5 + $0x18] sm:$0xff] }
  0x27   :  { %322 = vmatpush3.msra.mxu0 %v63_v7  ;;  %355 = vmatpush3.msra.mxu1 %v178_v23  ;;  %v168_v33 = vld [vmem:[#allocation5 + $0x10] sm:$0xff]  ;;  %v167_v34 = vld [vmem:[#allocation5 + $0x8] sm:$0xff]  ;;  %v166_v35 = vld [vmem:[#allocation5] sm:$0xff] }
  0x28   :  { %323 = vmatprep.subr.mxu0 %v466_v0  ;;  %356 = vmatprep.subr.mxu1 %v466_v0  ;;  %v51_v40 = vld [vmem:[%s565_s4] sm:$0xff]  ;;  %s470_s4 = smov [#allocation7]  }
  0x29   :  { %324 = vmatpush3.msra.mxu0 %v62_v10  ;;  %357 = vmatpush3.msra.mxu1 %v177_v24  ;;  %v76_v41 = vrot.slane %v51_v40, %v75_v39  ;;  %v151_v45 = vrot.slane %v51_v40, %v150_v43  ;;  %v158_v50 = vsub.f32 1.0, %v51_v40  ;;  %s269_s7 = sshll.u32 %s470_s4, 4  ;;  %s270_s7 = int_to_ptr.vmem [resolvable:$true] %s269_s7 }
  0x2a   :  { %325 = vmatprep.subr.mxu0 %v466_v0  ;;  %358 = vmatprep.subr.mxu1 %v466_v0  ;;  %s436_s8 = scalar_lea.vmem %s270_s7, 128  ;;  %p441_p11 = scmp.lt.s32.totalorder %s270_s7, %s270_s7 }
  0x2b   :  { %326 = vmatpush3.msra.mxu0 %v61_v11  ;;  %359 = vmatpush3.msra.mxu1 %v176_v25  ;;  %v162_v52 = vrot.slane %v158_v50, %v161_v51  ;;  %p437_p10 = scmp.ne.s32.totalorder %s270_s7, %s436_s8  ;;  %p442_p12 = scmp.lt.s32.totalorder %s436_s8, %s436_s8 }
  0x2c   :  { %327 = vmatprep.subr.mxu0 %v466_v0  ;;  %360 = vmatprep.subr.mxu1 %v466_v0 }
  0x2d   :  { %328 = vmatpush3.msra.mxu0 %v60_v12  ;;  %361 = vmatpush3.msra.mxu1 %v175_v26  ;;  %p443_p13 = por %p442_p12, %p441_p11 }
  0x2e   :  { %329 = vmatprep.subr.mxu0 %v466_v0  ;;  %362 = vmatprep.subr.mxu1 %v466_v0 }
  0x2f   :  { %330 = vmatpush3.msra.mxu0 %v59_v13  ;;  %363 = vmatpush3.msra.mxu1 %v174_v27  ;;  %p444_p0 = pnand %p443_p13, %p437_p10 }
  0x30   :  { %331 = vmatprep.subr.mxu0 %v466_v0  ;;  %364 = vmatprep.subr.mxu1 %v466_v0 }
  0x31   :  { %332 = vmatpush3.msra.mxu0 %v58_v14  ;;  %365 = vmatpush3.msra.mxu1 %v173_v28 }
  0x32   :  { %333 = vmatprep.subr.mxu0 %v466_v0  ;;  %366 = vmatprep.subr.mxu1 %v466_v0 }
  0x33   :  { %334 = vmatpush3.msra.mxu0 %v57_v15  ;;  %367 = vmatpush3.msra.mxu1 %v172_v29 }
  0x34   :  { %335 = vmatprep.subr.mxu0 %v466_v0  ;;  %368 = vmatprep.subr.mxu1 %v466_v0 }
  0x35   :  { %336 = vmatpush3.msra.mxu0 %v56_v16  ;;  %369 = vmatpush3.msra.mxu1 %v171_v30 }
  0x36   :  { %337 = vmatprep.subr.mxu0 %v466_v0  ;;  %370 = vmatprep.subr.mxu1 %v466_v0 }
  0x37   :  { %338 = vmatpush3.msra.mxu0 %v55_v17  ;;  %371 = vmatpush3.msra.mxu1 %v170_v31 }
  0x38   :  { %339 = vmatprep.subr.mxu0 %v466_v0  ;;  %372 = vmatprep.subr.mxu1 %v466_v0 }
  0x39   :  { %340 = vmatpush3.msra.mxu0 %v54_v18  ;;  %373 = vmatpush3.msra.mxu1 %v169_v32 }
  0x3a   :  { %341 = vmatprep.subr.mxu0 %v466_v0  ;;  %374 = vmatprep.subr.mxu1 %v466_v0 }
  0x3b   :  { %342 = vmatpush3.msra.mxu0 %v53_v19  ;;  %375 = vmatpush3.msra.mxu1 %v168_v33 }
  0x3c   :  { %343 = vmatprep.subr.mxu0 %v466_v0  ;;  %376 = vmatprep.subr.mxu1 %v466_v0 }
  0x3d   :  { %344 = vmatpush3.msra.mxu0 %v52_v20  ;;  %377 = vmatpush3.msra.mxu1 %v167_v34 }
  0x3e   :  { %346 = vmatmul.mubr.f32.vlgmr.msra.gmra.mxu0 %v536_v21  ;;  %378 = vmatprep.subr.mxu1 %v466_v0 }
  0x3f   :  { %379 = vmatpush3.msra.mxu1 %v166_v35  ;;  %393 = vset.pattern.permute.xlu0 %v469_v36 }
  0x40   :  { %253 = vperm.xlu0 %393, %v516_v6  }
  0x9b   :  { %v71_v42 = vpop.permute.xlu0 %70 }
  0x9c   :  { %v77_v44 = vmul.f32 %v76_v41, %v71_v42 }
  0xbb   :  { %v254_v61 = vpop.permute.xlu0 %253 }
  0xfe   :  { %v144_v46 = vpop.f32.mrf.mxu0 }
  0xff   :  { %v145_v47 = vadd.f32 %v144_v46, %v77_v44 }
 0x100   :  { %v347_v48 = vpop.f32.mrf.mxu0 }
 0x101   :  { %v152_v49 = vadd.f32 %v151_v45, %v145_v47 }
 0x103   :  { %394 = vtanh.f32 %v152_v49 }
 0x110   :  { %v395_v53 = vpop.eup %394 }
 0x111   :  { %v154_v54 = vmul.f32 %v395_v53, %v395_v53  ;;  %v157_v55 = vmul.f32 2.0, %v395_v53 }
 0x113   :  { %v163_v56 = vmul.f32 %v162_v52, %v157_v55  ;;  %v155_v57 = vsub.f32 1.0, %v154_v54 }
 0x115   :  { %v164_v58 = vadd.f32 %v163_v56, %v536_v21  ;;  %v156_v1 = vmul.f32 %v155_v57, %v76_v41 }
 0x117   :  { %v165_v59 = vmul.f32 %v164_v58, %v155_v57 }
 0x119   :  { %381 = vmatmul.mubr.f32.vlgmr.msra.gmra.mxu1 %v165_v59 }
 0x1d9   :  { %v248_v60 = vpop.f32.mrf.mxu1 }
 0x1da   :  { %v249_v62 = vadd.f32 %v395_v53, %v248_v60 }
 0x1db   :  { %v382_v63 = vpop.f32.mrf.mxu1 }
 0x1dc   :  { %v256_v0 = vmul.f32 %v254_v61, %v249_v62 }
 0x1de   :  { %v257_v2 = vsub.f32 %v156_v1, %v256_v0 }
 0x1e0   :  { %v258_v3 = vand.u32 2147483647, %v257_v2 }
 0x1e2   :  { %259 = vadd.xlane.f32.xlu1 %v258_v3 }
 0x26b   :  { %v260_v4 = vpop.xlane.xlu1 %259 }
 0x26c   :  { %v261_v5 = vmul.f32 0.0625, %v260_v4 }
 0x26e   :  { %262 = vst [vmem:[#allocation7] sm:$0xff] %v261_v5 }
 0x26f   :  { %447 = shalt.err (!%p444_p0)
}
 0x270   :  { %272 = dma.vmem_to_hbm [thread:$0]  %s270_s7, 128, %s566_s5, [#allocation4]  }
 0x271   :  { %460 = dma.done.wait [#allocation4], 128  }
 0x272   :  { %461 = vsyncadd [#allocation4], 4294967168 }
 0x273   :  { %276 = vsyncpa [#allocation3], 1 }
 0x274   :  { %277 = vsyncpa [#allocation6], 1 }
 0x275   :  { %278 = vsyncpa [#allocation4], 1 }

</bundles_post_ra>
